<compile_context>
chip_gen: v7x
topology: tpu7x:2x2x1
jax: 0.10.0
libtpu: 0.0.40
codegen_flags: <defaults>
</compile_context>

<pallas_src>
import functools

import jax
import jax.numpy as jnp
from jax.experimental import pallas as pl
from jax.experimental.pallas import tpu as pltpu


# ----------------------------- Pallas kernel -------------------------------

def _decoder_conv_kernel(x_ref, w_ref, aux_ref, o_ref, acc_ref, *,
                         H, W, Wp, Cout, Cg, eps):
    """Fused conv3x3 + bias + GroupNorm + ReLU for one batch element.

    x_ref   : [1, Cin, (H+3)*(W+2)]  zero-padded, flattened input (f32)
    w_ref   : [Cout, 9*Cin]          conv weights, tap-major (bf16)
    aux_ref : [Cout, Cout+3]         [group-aggregation matrix | bias | gamma | beta]
    o_ref   : [1, Cout, H*W]         output, lane/sublane dense (f32)
    acc_ref : [Cout, H*Wp]           f32 scratch for the conv accumulator
    """
    L = H * Wp

    # ---- 3x3 conv as ONE MXU matmul with K = 9*Cin -------------------------
    parts = []
    for t in range(9):
        dh, dw = divmod(t, 3)
        parts.append(x_ref[0, :, pl.ds(dh * Wp + dw, L)])          # (Cin, L)
    xs = jnp.concatenate(parts, axis=0).astype(jnp.bfloat16)       # (9*Cin, L)
    acc_ref[...] = jnp.dot(w_ref[...], xs,
                           preferred_element_type=jnp.float32)     # (Cout, L)

    # ---- compact the padded-width grid to lane-dense H*W columns -----------
    rows = [acc_ref[:, pl.ds(h * Wp, W)] for h in range(H)]        # H x (Cout, W)
    conv = jnp.concatenate(rows, axis=1)                           # (Cout, H*W)

    # ---- GroupNorm stats: single pass, conv bias folded analytically -------
    aux = aux_ref[...]
    agg = aux[:, :Cout]                                            # (Cout, Cout)
    b = aux[:, Cout:Cout + 1]                                      # (Cout, 1)
    gamma = aux[:, Cout + 1:Cout + 2]
    beta = aux[:, Cout + 2:Cout + 3]

    s = jnp.sum(conv, axis=1, keepdims=True)                       # (Cout, 1)
    q = jnp.sum(conv * conv, axis=1, keepdims=True)                # (Cout, 1)
    nv = float(H * W)
    sb = s + nv * b                                                # sum(conv + bias)
    qb = q + 2.0 * b * s + nv * b * b                              # sum((conv + bias)^2)
    gsq = jnp.dot(agg, jnp.concatenate([sb, qb], axis=1),
                  preferred_element_type=jnp.float32)              # (Cout, 2) group sums
    ng = float(Cg * H * W)
    mean = gsq[:, 0:1] / ng
    var = gsq[:, 1:2] / ng - mean * mean
    inv = jax.lax.rsqrt(var + eps)
    scale = inv * gamma
    shift = (b - mean) * scale + beta

    # ---- fused affine + ReLU, single dense (8, 256) store -------------------
    o_ref[0, :, :] = jnp.maximum(conv * scale + shift, 0.0)


# ------------------------------ wrapper (glue) ------------------------------

def decoder_conv_forward(x, weight, bias, gamma, beta, num_groups, eps=1e-5):
    """x: [B, Cin, H, W] (NCHW) -> [B, Cout, H, W]."""
    B, Cin, H, W = x.shape
    Cout = weight.shape[0]
    G = num_groups
    assert Cout % G == 0, "out_channels must be divisible by num_groups"
    Cg = Cout // G
    Wp = W + 2
    L = H * Wp
    Lp = (H + 3) * Wp  # single fused pad also provides the flat tail (>= 2*Wp+2)

    # One pad + reshape (extra bottom pad row supplies the flat-slice tail).
    xflat = jnp.pad(x, ((0, 0), (0, 0), (1, 2), (1, 1))).reshape(B, Cin, Lp)

    # Weights: (Cout, Cin, 3, 3) -> (Cout, dh, dw, Cin) -> dense (Cout, 9*Cin) bf16.
    w_r = jnp.transpose(weight, (0, 2, 3, 1)).reshape(Cout, 9 * Cin)
    w_r = w_r.astype(jnp.bfloat16)

    # Auxiliary block: block-diagonal group-aggregation matrix | bias | gamma | beta.
    ch = jnp.arange(Cout, dtype=jnp.int32) // Cg
    agg = (ch[:, None] == ch[None, :]).astype(jnp.float32)         # (Cout, Cout)
    aux = jnp.concatenate([agg,
                           bias.reshape(-1, 1),
                           gamma.reshape(-1, 1),
                           beta.reshape(-1, 1)], axis=1)           # (Cout, Cout+3)

    kernel = functools.partial(_decoder_conv_kernel,
                               H=H, W=W, Wp=Wp, Cout=Cout, Cg=Cg, eps=eps)

    out = pl.pallas_call(
        kernel,
        out_shape=jax.ShapeDtypeStruct((B, Cout, H * W), jnp.float32),
        grid=(B,),
        in_specs=[
            pl.BlockSpec((1, Cin, Lp), lambda b: (b, 0, 0)),
            pl.BlockSpec((Cout, 9 * Cin), lambda b: (0, 0)),
            pl.BlockSpec((Cout, Cout + 3), lambda b: (0, 0)),
        ],
        out_specs=pl.BlockSpec((1, Cout, H * W), lambda b: (b, 0, 0)),
        scratch_shapes=[pltpu.VMEM((Cout, L), jnp.float32)],
        compiler_params=pltpu.CompilerParams(
            dimension_semantics=("parallel",)),
    )(xflat, w_r, aux)

    # Free metadata-only reshape (no crop copy: kernel already compacted columns).
    return out.reshape(B, Cout, H, W)


class DecoderConv:
    """JAX/Pallas port of the PyTorch DecoderConv (forward only, eval mode)."""

    def __init__(self, in_ch, out_ch, key):
        assert out_ch % 4 == 0, "GroupNorm(out_ch // 4, out_ch) needs out_ch % 4 == 0"
        k1, k2, k3, k4 = jax.random.split(key, 4)
        fan_in = in_ch * 9
        bound = 1.0 / (fan_in ** 0.5)
        self.weight = jax.random.uniform(k1, (out_ch, in_ch, 3, 3),
                                         jnp.float32, -bound, bound)
        self.bias = jax.random.uniform(k2, (out_ch,), jnp.float32, -bound, bound)
        # (PyTorch default GN init is ones/zeros; perturb to exercise the affine path.)
        self.gamma = 1.0 + 0.1 * jax.random.normal(k3, (out_ch,), jnp.float32)
        self.beta = 0.1 * jax.random.normal(k4, (out_ch,), jnp.float32)
        self.num_groups = out_ch // 4

    def __call__(self, x):
        return decoder_conv_forward(x, self.weight, self.bias,
                                    self.gamma, self.beta, self.num_groups)


# ---------------------------- pure-JAX reference ----------------------------

def reference_forward(x, weight, bias, gamma, beta, num_groups, eps=1e-5):
    out = jax.lax.conv_general_dilated(
        x, weight, window_strides=(1, 1), padding=((1, 1), (1, 1)),
        dimension_numbers=("NCHW", "OIHW", "NCHW"))
    out = out + bias.reshape(1, -1, 1, 1)
    B, C, H, W = out.shape
    G = num_groups
    xr = out.reshape(B, G, (C // G) * H * W)
    mean = xr.mean(axis=2, keepdims=True)
    var = ((xr - mean) ** 2).mean(axis=2, keepdims=True)
    xn = ((xr - mean) / jnp.sqrt(var + eps)).reshape(B, C, H, W)
    y = xn * gamma.reshape(1, -1, 1, 1) + beta.reshape(1, -1, 1, 1)
    return jnp.maximum(y, 0.0)


if __name__ == "__main__":
    key = jax.random.PRNGKey(0)
    kx, kp = jax.random.split(key)

    B, Cin, Cout, H, W = 2, 4, 8, 16, 16
    x = jax.random.normal(kx, (B, Cin, H, W), dtype=jnp.float32)

    mod = DecoderConv(Cin, Cout, kp)
    fwd = jax.jit(lambda xx: mod(xx))

    out = jax.block_until_ready(fwd(x))
    assert out.shape == (B, Cout, H, W)
    assert bool(jnp.all(jnp.isfinite(out)))
    assert bool(jnp.all(out >= 0.0))  # ReLU output

    ref = reference_forward(x, mod.weight, mod.bias, mod.gamma, mod.beta,
                            mod.num_groups)
    err = float(jnp.max(jnp.abs(out - ref)))
    assert err < 5e-2, f"max abs err vs reference: {err}"

    print("KERNEL_OK")
</pallas_src>

<mosaic_0001>
module attributes {stable_mosaic.version = 11 : i64} {
  func.func @_decoder_conv_kernel(%arg0: i32, %arg1: memref<1x4x342xf32, #tpu.memory_space<vmem>>, %arg2: memref<8x36xbf16, #tpu.memory_space<vmem>>, %arg3: memref<8x11xf32, #tpu.memory_space<vmem>>, %arg4: memref<1x8x256xf32, #tpu.memory_space<vmem>>, %arg5: memref<8x288xf32, #tpu.memory_space<vmem>>) attributes {dimension_semantics = [#tpu.dimension_semantics<parallel>], iteration_bounds = array<i64: 2>, scalar_prefetch = 0 : i64, scratch_operands = 1 : i64, tpu.core_type = #tpu.core_type<tc>, window_params = [{transform_indices = @transform_0, window_bounds = array<i64: 1, 4, 342>}, {pipeline_mode = #tpu.pipeline_mode<synchronous>, transform_indices = @transform_1, window_bounds = array<i64: 8, 36>}, {pipeline_mode = #tpu.pipeline_mode<synchronous>, transform_indices = @transform_2, window_bounds = array<i64: 8, 11>}, {transform_indices = @transform_3, window_bounds = array<i64: 1, 8, 256>}]} {
    %c0 = arith.constant 0 : index
    %c0_0 = arith.constant 0 : index
    %c0_1 = arith.constant 0 : index
    %0 = vector.load %arg1[%c0, %c0_0, %c0_1] : memref<1x4x342xf32, #tpu.memory_space<vmem>>, vector<1x4x288xf32>
    %1 = vector.shape_cast %0 : vector<1x4x288xf32> to vector<4x288xf32>
    %c0_2 = arith.constant 0 : index
    %c0_3 = arith.constant 0 : index
    %c1 = arith.constant 1 : index
    %2 = vector.load %arg1[%c0_2, %c0_3, %c1] : memref<1x4x342xf32, #tpu.memory_space<vmem>>, vector<1x4x288xf32>
    %3 = vector.shape_cast %2 : vector<1x4x288xf32> to vector<4x288xf32>
    %c0_4 = arith.constant 0 : index
    %c0_5 = arith.constant 0 : index
    %c2 = arith.constant 2 : index
    %4 = vector.load %arg1[%c0_4, %c0_5, %c2] : memref<1x4x342xf32, #tpu.memory_space<vmem>>, vector<1x4x288xf32>
    %5 = vector.shape_cast %4 : vector<1x4x288xf32> to vector<4x288xf32>
    %c0_6 = arith.constant 0 : index
    %c0_7 = arith.constant 0 : index
    %c18 = arith.constant 18 : index
    %6 = vector.load %arg1[%c0_6, %c0_7, %c18] : memref<1x4x342xf32, #tpu.memory_space<vmem>>, vector<1x4x288xf32>
    %7 = vector.shape_cast %6 : vector<1x4x288xf32> to vector<4x288xf32>
    %c0_8 = arith.constant 0 : index
    %c0_9 = arith.constant 0 : index
    %c19 = arith.constant 19 : index
    %8 = vector.load %arg1[%c0_8, %c0_9, %c19] : memref<1x4x342xf32, #tpu.memory_space<vmem>>, vector<1x4x288xf32>
    %9 = vector.shape_cast %8 : vector<1x4x288xf32> to vector<4x288xf32>
    %c0_10 = arith.constant 0 : index
    %c0_11 = arith.constant 0 : index
    %c20 = arith.constant 20 : index
    %10 = vector.load %arg1[%c0_10, %c0_11, %c20] : memref<1x4x342xf32, #tpu.memory_space<vmem>>, vector<1x4x288xf32>
    %11 = vector.shape_cast %10 : vector<1x4x288xf32> to vector<4x288xf32>
    %c0_12 = arith.constant 0 : index
    %c0_13 = arith.constant 0 : index
    %c36 = arith.constant 36 : index
    %12 = vector.load %arg1[%c0_12, %c0_13, %c36] : memref<1x4x342xf32, #tpu.memory_space<vmem>>, vector<1x4x288xf32>
    %13 = vector.shape_cast %12 : vector<1x4x288xf32> to vector<4x288xf32>
    %c0_14 = arith.constant 0 : index
    %c0_15 = arith.constant 0 : index
    %c37 = arith.constant 37 : index
    %14 = vector.load %arg1[%c0_14, %c0_15, %c37] : memref<1x4x342xf32, #tpu.memory_space<vmem>>, vector<1x4x288xf32>
    %15 = vector.shape_cast %14 : vector<1x4x288xf32> to vector<4x288xf32>
    %c0_16 = arith.constant 0 : index
    %c0_17 = arith.constant 0 : index
    %c38 = arith.constant 38 : index
    %16 = vector.load %arg1[%c0_16, %c0_17, %c38] : memref<1x4x342xf32, #tpu.memory_space<vmem>>, vector<1x4x288xf32>
    %17 = vector.shape_cast %16 : vector<1x4x288xf32> to vector<4x288xf32>
    %18 = tpu.concatenate %1, %3, %5, %7, %9, %11, %13, %15, %17 in 0 : vector<4x288xf32>, vector<4x288xf32>, vector<4x288xf32>, vector<4x288xf32>, vector<4x288xf32>, vector<4x288xf32>, vector<4x288xf32>, vector<4x288xf32>, vector<4x288xf32> -> vector<36x288xf32>
    %19 = arith.truncf %18 : vector<36x288xf32> to vector<36x288xbf16>
    %c0_18 = arith.constant 0 : index
    %c0_19 = arith.constant 0 : index
    %20 = vector.load %arg2[%c0_18, %c0_19] : memref<8x36xbf16, #tpu.memory_space<vmem>>, vector<8x36xbf16>
    %cst = arith.constant dense<0.000000e+00> : vector<8x288xf32>
    %21 = tpu.matmul %20, %19, %cst {dimension_numbers = #tpu.dot_dimension_numbers<[1], [0], [0], [1], [0, 0, 1, 1], [], []>} : vector<8x36xbf16>, vector<36x288xbf16>, vector<8x288xf32> -> vector<8x288xf32>
    %c0_20 = arith.constant 0 : index
    %c0_21 = arith.constant 0 : index
    %22 = vector.load %arg5[%c0_20, %c0_21] : memref<8x288xf32, #tpu.memory_space<vmem>>, vector<8x288xf32>
    tpu.vector_store %arg5[%c0_20, %c0_21], %21 {strides = array<i32>} : memref<8x288xf32, #tpu.memory_space<vmem>>, vector<8x288xf32>,
    %c0_22 = arith.constant 0 : index
    %c0_23 = arith.constant 0 : index
    %23 = vector.load %arg5[%c0_22, %c0_23] : memref<8x288xf32, #tpu.memory_space<vmem>>, vector<8x16xf32>
    %c0_24 = arith.constant 0 : index
    %c18_25 = arith.constant 18 : index
    %24 = vector.load %arg5[%c0_24, %c18_25] : memref<8x288xf32, #tpu.memory_space<vmem>>, vector<8x16xf32>
    %c0_26 = arith.constant 0 : index
    %c36_27 = arith.constant 36 : index
    %25 = vector.load %arg5[%c0_26, %c36_27] : memref<8x288xf32, #tpu.memory_space<vmem>>, vector<8x16xf32>
    %c0_28 = arith.constant 0 : index
    %c54 = arith.constant 54 : index
    %26 = vector.load %arg5[%c0_28, %c54] : memref<8x288xf32, #tpu.memory_space<vmem>>, vector<8x16xf32>
    %c0_29 = arith.constant 0 : index
    %c72 = arith.constant 72 : index
    %27 = vector.load %arg5[%c0_29, %c72] : memref<8x288xf32, #tpu.memory_space<vmem>>, vector<8x16xf32>
    %c0_30 = arith.constant 0 : index
    %c90 = arith.constant 90 : index
    %28 = vector.load %arg5[%c0_30, %c90] : memref<8x288xf32, #tpu.memory_space<vmem>>, vector<8x16xf32>
    %c0_31 = arith.constant 0 : index
    %c108 = arith.constant 108 : index
    %29 = vector.load %arg5[%c0_31, %c108] : memref<8x288xf32, #tpu.memory_space<vmem>>, vector<8x16xf32>
    %c0_32 = arith.constant 0 : index
    %c126 = arith.constant 126 : index
    %30 = vector.load %arg5[%c0_32, %c126] : memref<8x288xf32, #tpu.memory_space<vmem>>, vector<8x16xf32>
    %c0_33 = arith.constant 0 : index
    %c144 = arith.constant 144 : index
    %31 = vector.load %arg5[%c0_33, %c144] : memref<8x288xf32, #tpu.memory_space<vmem>>, vector<8x16xf32>
    %c0_34 = arith.constant 0 : index
    %c162 = arith.constant 162 : index
    %32 = vector.load %arg5[%c0_34, %c162] : memref<8x288xf32, #tpu.memory_space<vmem>>, vector<8x16xf32>
    %c0_35 = arith.constant 0 : index
    %c180 = arith.constant 180 : index
    %33 = vector.load %arg5[%c0_35, %c180] : memref<8x288xf32, #tpu.memory_space<vmem>>, vector<8x16xf32>
    %c0_36 = arith.constant 0 : index
    %c198 = arith.constant 198 : index
    %34 = vector.load %arg5[%c0_36, %c198] : memref<8x288xf32, #tpu.memory_space<vmem>>, vector<8x16xf32>
    %c0_37 = arith.constant 0 : index
    %c216 = arith.constant 216 : index
    %35 = vector.load %arg5[%c0_37, %c216] : memref<8x288xf32, #tpu.memory_space<vmem>>, vector<8x16xf32>
    %c0_38 = arith.constant 0 : index
    %c234 = arith.constant 234 : index
    %36 = vector.load %arg5[%c0_38, %c234] : memref<8x288xf32, #tpu.memory_space<vmem>>, vector<8x16xf32>
    %c0_39 = arith.constant 0 : index
    %c252 = arith.constant 252 : index
    %37 = vector.load %arg5[%c0_39, %c252] : memref<8x288xf32, #tpu.memory_space<vmem>>, vector<8x16xf32>
    %c0_40 = arith.constant 0 : index
    %c270 = arith.constant 270 : index
    %38 = vector.load %arg5[%c0_40, %c270] : memref<8x288xf32, #tpu.memory_space<vmem>>, vector<8x16xf32>
    %39 = tpu.concatenate %23, %24, %25, %26, %27, %28, %29, %30, %31, %32, %33, %34, %35, %36, %37, %38 in 1 : vector<8x16xf32>, vector<8x16xf32>, vector<8x16xf32>, vector<8x16xf32>, vector<8x16xf32>, vector<8x16xf32>, vector<8x16xf32>, vector<8x16xf32>, vector<8x16xf32>, vector<8x16xf32>, vector<8x16xf32>, vector<8x16xf32>, vector<8x16xf32>, vector<8x16xf32>, vector<8x16xf32>, vector<8x16xf32> -> vector<8x256xf32>
    %c0_41 = arith.constant 0 : index
    %c0_42 = arith.constant 0 : index
    %40 = vector.load %arg3[%c0_41, %c0_42] : memref<8x11xf32, #tpu.memory_space<vmem>>, vector<8x11xf32>
    %41 = vector.extract_strided_slice %40 {offsets = [0, 0], sizes = [8, 8], strides = [1, 1]} : vector<8x11xf32> to vector<8x8xf32>
    %42 = vector.extract_strided_slice %40 {offsets = [0, 8], sizes = [8, 1], strides = [1, 1]} : vector<8x11xf32> to vector<8x1xf32>
    %43 = vector.extract_strided_slice %40 {offsets = [0, 9], sizes = [8, 1], strides = [1, 1]} : vector<8x11xf32> to vector<8x1xf32>
    %44 = vector.extract_strided_slice %40 {offsets = [0, 10], sizes = [8, 1], strides = [1, 1]} : vector<8x11xf32> to vector<8x1xf32>
    %cst_43 = arith.constant dense<0.000000e+00> : vector<8xf32>
    %45 = vector.multi_reduction <add>, %39, %cst_43 [1] : vector<8x256xf32> to vector<8xf32>
    %46 = vector.shape_cast %45 : vector<8xf32> to vector<8x1xf32>
    %47 = arith.mulf %39, %39 : vector<8x256xf32>
    %cst_44 = arith.constant dense<0.000000e+00> : vector<8xf32>
    %48 = vector.multi_reduction <add>, %47, %cst_44 [1] : vector<8x256xf32> to vector<8xf32>
    %49 = vector.shape_cast %48 : vector<8xf32> to vector<8x1xf32>
    %cst_45 = arith.constant 2.560000e+02 : f32
    %50 = vector.broadcast %cst_45 : f32 to vector<8x1xf32>
    %51 = arith.mulf %50, %42 : vector<8x1xf32>
    %52 = arith.addf %46, %51 : vector<8x1xf32>
    %cst_46 = arith.constant 2.000000e+00 : f32
    %53 = vector.broadcast %cst_46 : f32 to vector<8x1xf32>
    %54 = arith.mulf %53, %42 : vector<8x1xf32>
    %55 = arith.mulf %54, %46 : vector<8x1xf32>
    %56 = arith.addf %49, %55 : vector<8x1xf32>
    %cst_47 = arith.constant 2.560000e+02 : f32
    %57 = vector.broadcast %cst_47 : f32 to vector<8x1xf32>
    %58 = arith.mulf %57, %42 : vector<8x1xf32>
    %59 = arith.mulf %58, %42 : vector<8x1xf32>
    %60 = arith.addf %56, %59 : vector<8x1xf32>
    %61 = tpu.concatenate %52, %60 in 1 : vector<8x1xf32>, vector<8x1xf32> -> vector<8x2xf32>
    %cst_48 = arith.constant dense<0.000000e+00> : vector<8x2xf32>
    %62 = tpu.matmul %41, %61, %cst_48 {dimension_numbers = #tpu.dot_dimension_numbers<[1], [0], [0], [1], [0, 0, 1, 1], [], []>} : vector<8x8xf32>, vector<8x2xf32>, vector<8x2xf32> -> vector<8x2xf32>
    %63 = vector.extract_strided_slice %62 {offsets = [0, 0], sizes = [8, 1], strides = [1, 1]} : vector<8x2xf32> to vector<8x1xf32>
    %cst_49 = arith.constant 1.024000e+03 : f32
    %64 = vector.broadcast %cst_49 : f32 to vector<8x1xf32>
    %65 = arith.divf %63, %64 : vector<8x1xf32>
    %66 = vector.extract_strided_slice %62 {offsets = [0, 1], sizes = [8, 1], strides = [1, 1]} : vector<8x2xf32> to vector<8x1xf32>
    %cst_50 = arith.constant 1.024000e+03 : f32
    %67 = vector.broadcast %cst_50 : f32 to vector<8x1xf32>
    %68 = arith.divf %66, %67 : vector<8x1xf32>
    %69 = arith.mulf %65, %65 : vector<8x1xf32>
    %70 = arith.subf %68, %69 : vector<8x1xf32>
    %cst_51 = arith.constant 9.99999974E-6 : f32
    %71 = vector.broadcast %cst_51 : f32 to vector<8x1xf32>
    %72 = arith.addf %70, %71 : vector<8x1xf32>
    %73 = math.rsqrt %72 : vector<8x1xf32>
    %74 = arith.mulf %73, %43 : vector<8x1xf32>
    %75 = arith.subf %42, %65 : vector<8x1xf32>
    %76 = arith.mulf %75, %74 : vector<8x1xf32>
    %77 = arith.addf %76, %44 : vector<8x1xf32>
    %78 = vector.broadcast %74 : vector<8x1xf32> to vector<8x256xf32>
    %79 = arith.mulf %39, %78 : vector<8x256xf32>
    %80 = vector.broadcast %77 : vector<8x1xf32> to vector<8x256xf32>
    %81 = arith.addf %79, %80 : vector<8x256xf32>
    %cst_52 = arith.constant 0.000000e+00 : f32
    %82 = vector.broadcast %cst_52 : f32 to vector<8x256xf32>
    %83 = arith.maximumf %81, %82 : vector<8x256xf32>
    %c0_53 = arith.constant 0 : index
    %c0_54 = arith.constant 0 : index
    %c0_55 = arith.constant 0 : index
    %84 = vector.load %arg4[%c0_53, %c0_54, %c0_55] : memref<1x8x256xf32, #tpu.memory_space<vmem>>, vector<1x8x256xf32>
    %85 = vector.shape_cast %84 : vector<1x8x256xf32> to vector<8x256xf32>
    %86 = vector.shape_cast %83 : vector<8x256xf32> to vector<1x8x256xf32>
    tpu.vector_store %arg4[%c0_53, %c0_54, %c0_55], %86 {strides = array<i32>} : memref<1x8x256xf32, #tpu.memory_space<vmem>>, vector<1x8x256xf32>,
    return
  }
  func.func @transform_0(%arg0: i32) -> (i32, i32, i32) {
    %c0_i32 = arith.constant 0 : i32
    %c0_i32_0 = arith.constant 0 : i32
    %c0_i32_1 = arith.constant 0 : i32
    return %arg0, %c0_i32, %c0_i32_0 : i32, i32, i32
  }
  func.func @transform_1(%arg0: i32) -> (i32, i32) {
    %c0_i32 = arith.constant 0 : i32
    %c0_i32_0 = arith.constant 0 : i32
    %c0_i32_1 = arith.constant 0 : i32
    return %c0_i32, %c0_i32_0 : i32, i32
  }
  func.func @transform_2(%arg0: i32) -> (i32, i32) {
    %c0_i32 = arith.constant 0 : i32
    %c0_i32_0 = arith.constant 0 : i32
    %c0_i32_1 = arith.constant 0 : i32
    return %c0_i32, %c0_i32_0 : i32, i32
  }
  func.func @transform_3(%arg0: i32) -> (i32, i32, i32) {
    %c0_i32 = arith.constant 0 : i32
    %c0_i32_0 = arith.constant 0 : i32
    %c0_i32_1 = arith.constant 0 : i32
    return %arg0, %c0_i32, %c0_i32_0 : i32, i32, i32
  }
}

</mosaic_0001>

<bundles_post_ra>
// kernel: _lambda_.1
= control target key start
LH: loop header
LB: loop body
LE: loop exit
PB: predicated region body
PF: predicated region fallthrough
CT: control target
= control target key end

     0   :  { %s856_s12 = smov 0   ;;  %s945_s0 = inlined_call_operand.vmem [shape: f32[2,4,342], index: 0, kind: input, shape index: {}]   ;;  %s946_s1 = inlined_call_operand.vmem [shape: bf16[8,36], index: 1, kind: input, shape index: {}]   ;;  %s947_s2 = inlined_call_operand.vmem [shape: f32[8,11], index: 2, kind: input, shape index: {}]   ;;  %s948_s3 = inlined_call_operand.vmem [shape: f32[2,8,256], index: 3, kind: output, shape index: {}]  }
   0x1 LB: > { %s677_s13 = sadd.s32 4294967295, %s805_s12   ;;  %p681_p0 = scmp.ge.s32.totalorder %s805_s12, 1  ;;  %s805_s12 = sphi %s856_s12, %s13_s12  }
   0x2   : > { %p137_p1 = scmp.lt.s32.totalorder %s805_s12, 3 }
   0x4   : > { %p138_p2 = pnand %p681_p0, %p137_p1 }
   0x5   : > { %p161_p3 = scmp.lt.s32.totalorder (!%p138_p2), %s677_s13, 1  ;;  %v807_v2 = vmov (!%p138_p2), 0.0   ;;  %s808_s18 = smov (!%p138_p2), 126   ;;  %vm815_vm0 = vmmov (!%p138_p2), 0   ;;  %v816_v9 = vmov (!%p138_p2), 0   ;;  %vm186_vm1 = vcmask (!%p138_p2), 1039360  }
   0x6   : > { %141 = sbr.rel (%p138_p2) target bundleno = 1406 (0x57e), region = 32  ;;  %698 = vmatprep.subr.bf16.mxu1 (!%p138_p2), %v807_v2  ;;  %s809_s19 = smov (!%p138_p2), 110   ;;  %704 = vmatprep.mubr.msk.bf16.mxu1 (!%p138_p2), %vm815_vm0, %v807_v2  ;;  %vm276_vm2 = vcmask (!%p138_p2), 1043456   ;;  %vm210_vm3 = vcmask (!%p138_p2), 900096   ;;  %vm198_vm4 = vcmask (!%p138_p2), 1031168   ;;  %vm222_vm5 = vcmask (!%p138_p2), 891904  }
   0x7   : > { %s810_s20 = smov (!%p138_p2), 127   ;;  %s811_s21 = smov (!%p138_p2), 109   ;;  %345 = vmatprep.mubr.bf16.mxu0 (!%p138_p2), %v816_v9  ;;  %vm234_vm6 = vcmask (!%p138_p2), 883712   ;;  %vm246_vm7 = vcmask (!%p138_p2), 752640   ;;  %vm258_vm8 = vcmask (!%p138_p2), 744448   ;;  %vm270_vm9 = vcmask (!%p138_p2), 736256  }
   0x8   : > { %s812_s22 = smov (!%p138_p2), 108   ;;  %s813_s23 = smov (!%p138_p2), 92   ;;  %vm303_vm10 = vcmask (!%p138_p2), 1041408   ;;  %vm299_vm11 = vcmask (!%p138_p2), 293888   ;;  %vm396_vm12 = vcmask (!%p138_p2), 261120   ;;  %vm457_vm13 = vcmask (!%p138_p2), 130048  }
   0x9   : > { %s814_s24 = smov (!%p138_p2), 91   ;;  %s817_s25 = smov (!%p138_p2), 90   ;;  %vm460_vm14 = vcmask (!%p138_p2), 392192   ;;  %vm462_vm15 = vcmask (!%p138_p2), 523264  }
   0xa   : > { %s818_s28 = smov (!%p138_p2), 124   ;;  %s819_s29 = smov (!%p138_p2), 122  }
   0xb   : > { %s820_s30 = smov (!%p138_p2), 100   ;;  %s821_s4 = smov (!%p138_p2), 120  }
   0xc   : > { %s822_s5 = smov (!%p138_p2), 118   ;;  %s823_s6 = smov (!%p138_p2), 114  }
   0xd   : > { %s950_s13 = smov (!%p161_p3, %s677_s13), 1  ;;  %s824_s7 = smov 116  }
   0xe   : > { %s713_s14 = smul.u32 12, %s950_s13  ;;  %s825_s8 = smov 112  }
   0xf   : > { %s826_s9 = smov 106   ;;  %s827_s10 = smov 104  }
  0x10   : > { %s165_s17 = scalar_lea.vmem %s945_s0, %s713_s14  ;;  %s828_s11 = smov 102  }
  0x11   : > { %v870_v0 = vld [vmem:[%s165_s17] sm:$0xff]  ;;  %v173_v1 = vld [vmem:[%s165_s17 + $0x8] sm:$0xf]  ;;  %s829_s14 = smov 98   ;;  %s830_s17 = smov 121  }
  0x12   : > { %192 = vrot.lane.b32.xlu0 %v870_v0, %s808_s18  ;;  %v179_v3 = vcombine.low %v173_v1, %v173_v1  ;;  %v176_v4 = vcombine.high %v870_v0, %v870_v0  ;;  %v178_v6 = vcombine.low %v870_v0, %v870_v0 }
  0x14   : > { %v761_v5 = vpack.i.bf16 %v179_v3, %v870_v0  ;;  %v756_v7 = vpack.i.bf16 %v173_v1, %v176_v4  ;;  %v786_v8 = vpack.i.bf16 %v176_v4, %v870_v0 }
  0x16   : > { %762 = vrot.lane.b32.xlu1 %v761_v5, %s809_s19  ;;  %752 = vrot.lane.b32.xlu0 %v761_v5, %s810_s20 }
  0x1a   : > { %180 = vrot.lane.b32.xlu1 %v178_v6, %s810_s20  ;;  %757 = vrot.lane.b32.xlu0 %v756_v7, %s808_s18  ;;  %s832_s20 = smov 8  }
  0x1e   : > { %204 = vrot.lane.b32.xlu1 %v178_v6, %s809_s19  ;;  %767 = vrot.lane.b32.xlu0 %v756_v7, %s811_s21 }
  0x22   : > { %772 = vrot.lane.b32.xlu1 %v761_v5, %s812_s22  ;;  %777 = vrot.lane.b32.xlu0 %v756_v7, %s813_s23 }
  0x26   : > { %782 = vrot.lane.b32.xlu1 %v761_v5, %s814_s24  ;;  %216 = vrot.lane.b32.xlu0 %v870_v0, %s811_s21  ;;  %s835_s21 = smov 7  }
  0x2a   : > { %228 = vrot.lane.b32.xlu1 %v178_v6, %s812_s22  ;;  %240 = vrot.lane.b32.xlu0 %v870_v0, %s813_s23 }
  0x2e   : > { %252 = vrot.lane.b32.xlu1 %v178_v6, %s814_s24  ;;  %787 = vrot.lane.b32.xlu0 %v786_v8, %s817_s25 }
  0x32   : > { %268 = vrot.lane.b32.xlu1 %v173_v1, %s817_s25 }
  0x84   : > { %v193_v10 = vpop.permute.xlu0 %192 }
  0x88   : > { %v763_v11 = vpop.permute.xlu1 %762  ;;  %v753_v12 = vpop.permute.xlu0 %752 }
  0x89   : > { %v755_v13 = vunpack.i.h.bf16 %v753_v12  ;;  %v754_v14 = vunpack.i.l.bf16 %v753_v12  ;;  %v765_v15 = vunpack.i.h.bf16 %v763_v11  ;;  %v764_v16 = vunpack.i.l.bf16 %v763_v11 }
  0x8b   : > { %v188_v17 = vsel %vm186_vm1, %v754_v14, %v755_v13  ;;  %v279_v22 = vsel %vm276_vm2, %v173_v1, %v755_v13  ;;  %v212_v27 = vsel %vm210_vm3, %v764_v16, %v765_v15 }
  0x8c   : > { %v181_v18 = vpop.permute.xlu1 %180  ;;  %v758_v19 = vpop.permute.xlu0 %757  ;;  %v278_v23 = vsel %vm276_vm2, %v176_v4, %v188_v17 }
  0x8d   : > { %v760_v20 = vunpack.i.h.bf16 %v758_v19  ;;  %v759_v21 = vunpack.i.l.bf16 %v758_v19  ;;  %v187_v24 = vsel %vm186_vm1, %v181_v18, %v754_v14  ;;  %v298_v18 = vld [vmem:[%s946_s1] sm:$0xf]  ;;  %vm425_vm1 = vcmask 932864  }
  0x8e   : > { %v277_v35 = vsel %vm276_vm2, %v870_v0, %v187_v24 }
  0x8f   : > { %v282_v25 = vsel %vm276_vm2, %v760_v20, %v765_v15  ;;  %v200_v26 = vsel %vm198_vm4, %v759_v21, %v760_v20  ;;  %v199_v34 = vsel %vm198_vm4, %v193_v10, %v759_v21  ;;  %vm468_vm4 = vcmask 916480  }
  0x90   : > { %v205_v28 = vpop.permute.xlu1 %204  ;;  %v768_v29 = vpop.permute.xlu0 %767  ;;  %v291_v30 = vpack.c.bf16 %v282_v25, %v279_v22  ;;  %v281_v31 = vsel %vm276_vm2, %v200_v26, %v212_v27 }
  0x91   : > { %v211_v32 = vsel %vm210_vm3, %v205_v28, %v764_v16  ;;  %v290_v33 = vpack.c.bf16 %v281_v31, %v278_v23  ;;  %v770_v38 = vunpack.i.h.bf16 %v768_v29  ;;  %v769_v39 = vunpack.i.l.bf16 %v768_v29 }
  0x92   : > { %699 = vmatpush3.bf16.msra.mxu1 %v291_v30  ;;  %v280_v36 = vsel %vm276_vm2, %v199_v34, %v211_v32  ;;  %vm451_vm3 = vcmask 818176  }
  0x93   : > { %313 = vmatprep.subr.bf16.mxu0 %v290_v33  ;;  %v289_v37 = vpack.c.bf16 %v280_v36, %v277_v35  ;;  %700 = vmatprep.subr.bf16.mxu1 %v807_v2  ;;  %v224_v48 = vsel %vm222_vm5, %v769_v39, %v770_v38 }
  0x94   : > { %v773_v40 = vpop.permute.xlu1 %772  ;;  %v778_v41 = vpop.permute.xlu0 %777 }
  0x95   : > { %v775_v42 = vunpack.i.h.bf16 %v773_v40  ;;  %v774_v43 = vunpack.i.l.bf16 %v773_v40  ;;  %v780_v44 = vunpack.i.h.bf16 %v778_v41  ;;  %v779_v45 = vunpack.i.l.bf16 %v778_v41  ;;  %314 = vmatpush1.bf16.msra.mxu0 %v289_v37 }
  0x97   : > { %v236_v51 = vsel %vm234_vm6, %v774_v43, %v775_v42  ;;  %v248_v52 = vsel %vm246_vm7, %v779_v45, %v780_v44  ;;  %v285_v54 = vsel %vm276_vm2, %v770_v38, %v775_v42 }
  0x98   : > { %v783_v46 = vpop.permute.xlu1 %782  ;;  %v217_v47 = vpop.permute.xlu0 %216  ;;  %v284_v59 = vsel %vm276_vm2, %v224_v48, %v236_v51 }
  0x99   : > { %v785_v49 = vunpack.i.h.bf16 %v783_v46  ;;  %v784_v50 = vunpack.i.l.bf16 %v783_v46  ;;  %v223_v62 = vsel %vm222_vm5, %v217_v47, %v769_v39  ;;  %vm501_vm5 = vcmask 7168  }
  0x9b   : > { %v260_v53 = vsel %vm258_vm8, %v784_v50, %v785_v49  ;;  %v288_v55 = vsel %vm276_vm2, %v780_v44, %v785_v49 }
  0x9c   : > { %v229_v56 = vpop.permute.xlu1 %228  ;;  %v241_v57 = vpop.permute.xlu0 %240  ;;  %v294_v58 = vpack.c.bf16 %v288_v55, %v285_v54  ;;  %v287_v60 = vsel %vm276_vm2, %v248_v52, %v260_v53 }
  0x9d   : > { %v293_v61 = vpack.c.bf16 %v287_v60, %v284_v59  ;;  %v235_v63 = vsel %vm234_vm6, %v229_v56, %v774_v43  ;;  %v247_v0 = vsel %vm246_vm7, %v241_v57, %v779_v45  ;;  %vm503_vm6 = vcmask 64512  }
  0x9e   : > { %701 = vmatpush3.bf16.msra.mxu1 %v294_v58  ;;  %v283_v7 = vsel %vm276_vm2, %v223_v62, %v235_v63 }
  0x9f   : > { %315 = vmatprep.subr.bf16.mxu0 %v293_v61  ;;  %702 = vmatprep.subr.bf16.mxu1 %v807_v2 }
  0xa0   : > { %v253_v1 = vpop.permute.xlu1 %252  ;;  %v788_v3 = vpop.permute.xlu0 %787 }
  0xa1   : > { %v259_v4 = vsel %vm258_vm8, %v253_v1, %v784_v50  ;;  %v790_v5 = vunpack.i.h.bf16 %v788_v3  ;;  %v789_v6 = vunpack.i.l.bf16 %v788_v3 }
  0xa2   : > { %v286_v8 = vsel %vm276_vm2, %v247_v0, %v259_v4  ;;  %vm466_vm2 = vcmask 785408   ;;  %v477_v0 = vld [vmem:[%s947_s2] sm:$0xff] }
  0xa3   : > { %v292_v9 = vpack.c.bf16 %v286_v8, %v283_v7  ;;  %v271_v10 = vsel %vm270_vm9, %v789_v6, %v790_v5  ;;  %v486_v1 = vmul.f32 256.0, %v477_v0  ;;  %v488_v3 = vmul.f32 2.0, %v477_v0 }
  0xa4   : > { %v269_v11 = vpop.permute.xlu1 %268  ;;  %v295_v12 = vpack.c.bf16 %v271_v10, %v271_v10 }
  0xa5   : > { %v272_v13 = vsel %vm270_vm9, %v790_v5, %v269_v11  ;;  %v297_v14 = vpack.c.bf16 %v269_v11, %v269_v11  ;;  %316 = vmatpush1.bf16.msra.mxu0 %v292_v9  ;;  %v491_v7 = vmul.f32 %v486_v1, %v477_v0 }
  0xa6   : > { %v296_v15 = vpack.c.bf16 %v272_v13, %v272_v13  ;;  %v305_v16 = vsel %vm303_vm10, %v295_v12, 0 }
  0xa7   : > { %v311_v17 = vsel %vm303_vm10, %v297_v14, 0 }
  0xa8   : > { %685 = vmatprep.subr.msk.bf16.mxu0 %vm303_vm10, %v296_v15  ;;  %703 = vmatpush3.bf16.msra.mxu1 %v311_v17 }
  0xa9   : > { %318 = vmatpush1.bf16.msra.mxu0 %v305_v16 }
  0xaa   : > { %708 = vmatprep.subr.mxu0 %v807_v2 }
  0xab   : > { %705 = vmatmul.mubr.msk.bf16.vlgmr.msra.gmra.mrb[0].mxu1 %vm299_vm11, %v298_v18 }
  0xac   : > { %686 = vmatmul.mubr.msk.bf16.vlgmr.msra.gmra.mrb[0].mxu0 %vm299_vm11, %v298_v18  ;;  %v833_v18 = vmov 1  }
  0xad   : > { %710 = vmatprep.mubr.msk.f32.mxu0 %vm815_vm0, %v807_v2  ;;  %vm464_vm0 = vcmask 654336   ;;  %791 = vset.pattern.permute.xlu0 %v833_v18 }
 0x17e   : > { %v388_v19 = vpop.f32.mrb[0].mxu1 }
 0x17f   : > { %397 = vst.msk [vmem:[#allocation2 + $0x10] sm:$0xff] %vm396_vm12, %v388_v19  ;;  %v347_v20 = vpop.f32.mrb[0].mxu0  ;;  %v706_v21 = vpop.f32.mrb[1].mxu1 }
 0x180   : > { %v349_v22 = vpop.f32.mrb[1].mxu0  ;;  %v391_v23 = vpop.f32.mrb[2].mxu1  ;;  %405 = vrot.lane.b32.xlu1 %v347_v20, %s818_s28 }
 0x181   : > { %v351_v24 = vpop.f32.mrb[2].mxu0  ;;  %v707_v25 = vpop.f32.mrb[3].mxu1 }
 0x182   : > { %v352_v26 = vpop.f32.mrb[3].mxu0 }
 0x184   : > { %408 = vrot.lane.b32.xlu1 %v347_v20, %s819_s29 }
 0x186   : > { %v400_v27 = vld [vmem:[#allocation2 + $0x10] sm:$0xff] }
 0x187   : > { %449 = vrot.lane.b32.xlu0 %v400_v27, %s820_s30 }
 0x188   : > { %411 = vrot.lane.b32.xlu1 %v347_v20, %s821_s4 }
 0x18b   : > { %402 = vrot.lane.b32.xlu0 %v347_v20, %s808_s18 }
 0x18c   : > { %414 = vrot.lane.b32.xlu1 %v347_v20, %s822_s5 }
 0x18f   : > { %421 = vrot.lane.b32.xlu0 %v347_v20, %s823_s6 }
 0x190   : > { %417 = vrot.lane.b32.xlu1 %v347_v20, %s824_s7 }
 0x193   : > { %431 = vrot.lane.b32.xlu0 %v349_v22, %s809_s19  ;;  %s831_s19 = smov 1  }
 0x194   : > { %428 = vrot.lane.b32.xlu1 %v349_v22, %s825_s8 }
 0x197   : > { %434 = vrot.lane.b32.xlu0 %v349_v22, %s812_s22 }
 0x198   : > { %447 = vrot.lane.b32.xlu1 %v349_v22, %s820_s30 }
 0x19b   : > { %437 = vrot.lane.b32.xlu0 %v349_v22, %s826_s9 }
 0x19c   : > { %423 = vrot.lane.b32.xlu1 %v349_v22, %s823_s6 }
 0x19f   : > { %440 = vrot.lane.b32.xlu0 %v349_v22, %s827_s10 }
 0x1a3   : > { %443 = vrot.lane.b32.xlu0 %v349_v22, %s828_s11  ;;  %v834_v22 = vmov 8  }
 0x1a4   : > { %792 = vset.pattern.permute.xlu1 %v834_v22 }
 0x1a7   : > { %454 = vrot.lane.b32.xlu0 %v400_v27, %s829_s14 }
 0x1f2   : > { %v406_v2 = vpop.permute.xlu1 %405 }
 0x1f6   : > { %v409_v28 = vpop.permute.xlu1 %408 }
 0x1f9   : > { %v450_v29 = vpop.permute.xlu0 %449 }
 0x1fa   : > { %v412_v30 = vpop.permute.xlu1 %411 }
 0x1fd   : > { %v403_v31 = vpop.permute.xlu0 %402 }
 0x1fe   : > { %v415_v32 = vpop.permute.xlu1 %414  ;;  %v458_v37 = vsel %vm457_vm13, %v347_v20, %v403_v31 }
 0x1ff   : > { %v459_v39 = vsel %vm396_vm12, %v458_v37, %v406_v2 }
 0x200   : > { %v461_v42 = vsel %vm460_vm14, %v459_v39, %v409_v28 }
 0x201   : > { %v422_v33 = vpop.permute.xlu0 %421  ;;  %v463_v43 = vsel %vm462_vm15, %v461_v42, %v412_v30 }
 0x202   : > { %v418_v34 = vpop.permute.xlu1 %417  ;;  %v465_v48 = vsel %vm464_vm0, %v463_v43, %v415_v32 }
 0x203   : > { %v467_v54 = vsel %vm466_vm2, %v465_v48, %v418_v34 }
 0x205   : > { %v432_v35 = vpop.permute.xlu0 %431 }
 0x206   : > { %v429_v36 = vpop.permute.xlu1 %428 }
 0x207   : > { %v470_v45 = vsel %vm457_vm13, %v429_v36, %v432_v35 }
 0x209   : > { %v435_v38 = vpop.permute.xlu0 %434 }
 0x20a   : > { %v448_v40 = vpop.permute.xlu1 %447  ;;  %v471_v47 = vsel %vm396_vm12, %v470_v45, %v435_v38 }
 0x20b   : > { %v452_v55 = vsel %vm451_vm3, %v448_v40, %v450_v29 }
 0x20d   : > { %v438_v41 = vpop.permute.xlu0 %437 }
 0x20e   : > { %v424_v46 = vpop.permute.xlu1 %423  ;;  %v472_v49 = vsel %vm460_vm14, %v471_v47, %v438_v41 }
 0x20f   : > { %v426_v52 = vsel %vm425_vm1, %v422_v33, %v424_v46 }
 0x210   : > { %v926_v56 = vsel %vm468_vm4, %v467_v54, %v426_v52 }
 0x211   : > { %v441_v44 = vpop.permute.xlu0 %440  ;;  %v481_v61 = vmul.f32 %v926_v56, %v926_v56 }
 0x212   : > { %v473_v50 = vsel %vm462_vm15, %v472_v49, %v441_v44 }
 0x215   : > { %v444_v51 = vpop.permute.xlu0 %443 }
 0x216   : > { %v474_v53 = vsel %vm464_vm0, %v473_v50, %v444_v51 }
 0x217   : > { %v475_v58 = vsel %vm466_vm2, %v474_v53, %v452_v55 }
 0x219   : > { %v455_v57 = vpop.permute.xlu0 %454 }
 0x21a   : > { %v476_v59 = vsel %vm468_vm4, %v475_v58, %v455_v57 }
 0x21b   : > { %v478_v60 = vadd.f32 %v476_v59, %v926_v56  ;;  %v482_v62 = vmul.f32 %v476_v59, %v476_v59 }
 0x21d   : > { %479 = vadd.xlane.f32.xlu1 %v478_v60  ;;  %v483_v63 = vadd.f32 %v482_v62, %v481_v61 }
 0x21f   : > { %484 = vadd.xlane.f32.xlu0 %v483_v63 }
 0x2aa   : > { %v480_v4 = vpop.xlane.xlu1 %479 }
 0x2ab   : > { %v487_v5 = vadd.f32 %v486_v1, %v480_v4  ;;  %v489_v6 = vmul.f32 %v488_v3, %v480_v4 }
 0x2ac   : > { %v485_v8 = vpop.xlane.xlu0 %484 }
 0x2ad   : > { %v490_v9 = vadd.f32 %v489_v6, %v485_v8  ;;  %494 = vrot.lane.b32.xlu0 %v487_v5, %s821_s4 }
 0x2af   : > { %v492_v10 = vadd.f32 %v491_v7, %v490_v9 }
 0x2b1   : > { %498 = vrot.lane.b32.xlu1 %v492_v10, %s830_s17  ;;  %587 = vrot.lane.b32.xlu0 %v477_v0, %s821_s4 }
 0x31f   : > { %v495_v11 = vpop.permute.xlu0 %494 }
 0x323   : > { %v499_v12 = vpop.permute.xlu1 %498  ;;  %v588_v23 = vpop.permute.xlu0 %587 }
 0x324   : > { %v502_v13 = vsel %vm501_vm5, %v495_v11, %v499_v12 }
 0x325   : > { %709 = vmatpush3.msra.mxu0 %v502_v13 }
 0x326   : > { %711 = vmatmul.mubr.msk.f32.vlgmr.msra.gmra.mrb[4].mxu0 %vm503_vm6, %v477_v0 }
 0x3f9   : > { %v573_v14 = vpop.f32.mrb[4].mxu0 }
 0x3fa   : > { %v578_v15 = vmul.f32 0.0009765625, %v573_v14  ;;  %v712_v16 = vpop.f32.mrb[5].mxu0 }
 0x3fc   : > { %v579_v17 = vmul.f32 %v578_v15, %v578_v15 }
 0x3fe   : > { %581 = vrot.lane.b32.xlu1 %v579_v17, %s831_s19 }
 0x402   : > { %592 = vrot.lane.b32.xlu1 %v578_v15, %s832_s20 }
 0x406   : > { %601 = vrot.lane.b32.xlu1 %v477_v0, %s808_s18  ;;  %s691_s18 = sshll.u32 %s950_s13, 4 }
 0x407   : > { %s170_s24 = scalar_lea.vmem %s948_s3, %s691_s18 }
 0x470   : > { %v582_v19 = vpop.permute.xlu1 %581 }
 0x471   : > { %v584_v20 = vsub.f32 %v578_v15, %v582_v19 }
 0x473   : > { %v585_v21 = vadd.f32 1e-05, %v584_v20 }
 0x474   : > { %v593_v26 = vpop.permute.xlu1 %592 }
 0x475   : > { %797 = vrsqrt.f32 %v585_v21  ;;  %v595_v27 = vsub.f32 %v477_v0, %v593_v26 }
 0x478   : > { %v602_v28 = vpop.permute.xlu1 %601 }
 0x47f   : > { %v798_v24 = vpop.eup %797 }
 0x480   : > { %v590_v25 = vmul.f32 %v798_v24, %v588_v23 }
 0x482   : > { %597 = vrot.lane.b32.xlu0 %v590_v25, %s835_s21 }
 0x486   : > { %606 = vperm.xlu0 %791, %v590_v25  }
 0x48a   : > { %793 = vset.pattern.permute.xlu0 %v834_v22 }
 0x4f4   : > { %v598_v2 = vpop.permute.xlu0 %597 }
 0x4f5   : > { %v600_v29 = vmul.f32 %v598_v2, %v595_v27 }
 0x4f7   : > { %v604_v30 = vadd.f32 %v602_v28, %v600_v29 }
 0x4f9   : > { %613 = vperm.xlu1 %792, %v604_v30  }
 0x505   : > { %v607_v31 = vpop.permute.xlu0 %606 }
 0x506   : > { %v609_v32 = vmul.f32 %v607_v31, %v926_v56  ;;  %v610_v33 = vmul.f32 %v607_v31, %v476_v59 }
 0x578   : > { %v614_v34 = vpop.permute.xlu1 %613 }
 0x579   : > { %v616_v35 = vadd.f32 %v614_v34, %v609_v32  ;;  %v617_v36 = vadd.f32 %v614_v34, %v610_v33 }
 0x57b   : > { %v618_v37 = vmax.f32 %v616_v35, 0.0  ;;  %v619_v38 = vmax.f32 %v617_v36, 0.0 }
 0x57d   : > { %620 = vst [vmem:[%s170_s24] sm:$0xff] %v618_v37  ;;  %621 = vst [vmem:[%s170_s24 + $0x8] sm:$0xff] %v619_v38 }
 0x57e PF: > { %s13_s12 = sadd.s32 1, %s805_s12  }
 0x57f   : > { %p10_p4 = scmp.ge.s32.totalorder %s13_s12, 4  }
 0x581   :  { %12 = sbr.rel (!%p10_p4) target bundleno = 1 (0x1), region = 62 }

</bundles_post_ra>
